<compile_context>
chip_gen: v6e
topology: v6e:2x2x1
jax: 0.10.0
libtpu: 0.0.40
codegen_flags: <defaults>
</compile_context>

<pallas_src>
import functools
import math

import jax
import jax.numpy as jnp
from jax.experimental import pallas as pl
from jax.experimental.pallas import tpu as pltpu


def _round_up(n, m):
    return ((n + m - 1) // m) * m


def _sublane(dtype):
    # dtype-aware sublane packing: 8 rows for 4-byte, 16 for 2-byte, 32 for 1-byte.
    return max(8, 32 // jnp.dtype(dtype).itemsize)


def _layernorm_kernel(x_ref, gamma_ref, beta_ref, o_ref, *, eps, features):
    # Standard path: one logical row per sublane row, last dim = full feature dim.
    x = x_ref[...].astype(jnp.float32)
    inv_f = 1.0 / features
    mean = jnp.sum(x, axis=-1, keepdims=True) * inv_f
    # Fused single-pass statistics (one block traversal, no `centered` temp).
    # TODO(synk): E[x^2]-mean^2 loses precision when |mean| >> std; switch back
    # to the two-pass (x - mean) form if that input regime matters.
    var = jnp.maximum(jnp.sum(x * x, axis=-1, keepdims=True) * inv_f - mean * mean, 0.0)
    inv = 1.0 / (jnp.sqrt(var) + eps)  # exact division: large VALU/EUP slack here
    y = (x - mean) * inv * gamma_ref[...] + beta_ref[...]
    o_ref[...] = y.astype(o_ref.dtype)


def _layernorm_packed_kernel(x_ref, gamma_ref, beta_ref, o_ref, *, eps, features, group):
    # Lane-packed path: `group` logical rows share one 128-lane row, so the
    # in/out BlockSpecs (and the HBM<->VMEM DMAs / VMEM tiles) are fully
    # lane-dense even for tiny feature dims.  Per-segment statistics use
    # statically sliced windows; the loop is fully unrolled (group <= 16).
    inv_f = 1.0 / features
    for g in range(group):
        lo = g * features
        hi = lo + features
        seg = x_ref[:, lo:hi].astype(jnp.float32)
        mean = jnp.sum(seg, axis=-1, keepdims=True) * inv_f
        var = jnp.maximum(
            jnp.sum(seg * seg, axis=-1, keepdims=True) * inv_f - mean * mean, 0.0)
        inv = 1.0 / (jnp.sqrt(var) + eps)
        y = (seg - mean) * inv * gamma_ref[:, lo:hi] + beta_ref[:, lo:hi]
        o_ref[:, lo:hi] = y.astype(o_ref.dtype)


def _row_tile(n_rows, width, itemsize, sub):
    # ~2 MiB per input tile: 1-2 MiB tiles already hit ~85% of the HBM roofline,
    # and (2x in + 2x out double buffers + f32 temporaries) stays well inside
    # v7x's 64 MiB VMEM.  Keep the grid deep (>= ~16 steps => >= 8 per TC on a
    # v7x megacore) so prologue/epilogue DMAs stay hidden.
    target_bytes = 2 << 20
    tr = max(sub, (target_bytes // max(width * itemsize, 1)) // sub * sub)
    if n_rows >= 16 * sub:
        tr = min(tr, max(sub, (n_rows // 16) // sub * sub))
    tr = min(tr, _round_up(n_rows, sub))
    return tr


def layer_norm(x, gamma, beta, *, eps=1e-6):
    """LayerNorm over the last axis of x. gamma/beta have shape (features,)."""
    features = x.shape[-1]
    lead_shape = x.shape[:-1]
    rows = int(math.prod(lead_shape)) if lead_shape else 1

    x2 = x.reshape(rows, features)
    gamma_f = gamma.astype(jnp.float32)
    beta_f = beta.astype(jnp.float32)

    try:
        vmem_cap = int(pltpu.get_tpu_info().vmem_capacity_bytes)
    except Exception:
        vmem_cap = 64 << 20  # conservative fallback (v7x per-TC VMEM)

    in_b = jnp.dtype(x.dtype).itemsize
    sub = _sublane(x.dtype)

    # Lane packing for small feature dims -> 128-dense output blocks
    # (unmasked vst + dense DMA, the biggest measured lever for this case).
    pack = (features < 128) and (128 % features == 0) and (features >= 8)

    if pack:
        group = 128 // features
        width = 128
        rows_p = _round_up(rows, group)
        if rows_p != rows:
            x2 = jnp.pad(x2, ((0, rows_p - rows), (0, 0)))
        x_in = x2.reshape(rows_p // group, width)  # contiguous -> free reshape
        n_rows = rows_p // group
        gamma_in = jnp.tile(gamma_f, (group,)).reshape(1, width)
        beta_in = jnp.tile(beta_f, (group,)).reshape(1, width)
        kernel = functools.partial(
            _layernorm_packed_kernel, eps=eps, features=features, group=group)
    else:
        # TODO(synk): feature dims < 128 that do not divide 128 still take the
        # masked-store path; lane packing with a remainder segment is skipped.
        group = 1
        width = features
        x_in = x2
        n_rows = rows
        gamma_in = gamma_f.reshape(1, width)
        beta_in = beta_f.reshape(1, width)
        kernel = functools.partial(_layernorm_kernel, eps=eps, features=features)

    tr = _row_tile(n_rows, width, in_b, sub)
    grid = (pl.cdiv(n_rows, tr),)

    # VMEM budget: double-buffered in/out tiles + in-kernel f32 temporaries
    # (x upcast, x*x, y, slack) + params.  Capped well below physical VMEM.
    tile_bytes = (2 * tr * width * in_b        # double-buffered input
                  + 2 * tr * width * in_b      # double-buffered output
                  + 4 * tr * width * 4         # f32 intermediates
                  + 2 * width * 4)             # gamma/beta
    vmem_limit = int(min(int(vmem_cap * 0.9), max(32 << 20, tile_bytes * 2)))

    out = pl.pallas_call(
        kernel,
        out_shape=jax.ShapeDtypeStruct((n_rows, width), x.dtype),
        grid_spec=pltpu.PrefetchScalarGridSpec(
            num_scalar_prefetch=0,
            grid=grid,
            in_specs=[
                # Default double buffering; bump to pl.Buffered(3) only if xprof
                # shows exposed per-step DMA latency after the tile shrink.
                pl.BlockSpec((tr, width), lambda i: (i, 0)),
                pl.BlockSpec((1, width), lambda i: (0, 0)),   # VMEM-resident gamma
                pl.BlockSpec((1, width), lambda i: (0, 0)),   # VMEM-resident beta
            ],
            out_specs=pl.BlockSpec((tr, width), lambda i: (i, 0)),
        ),
        compiler_params=pltpu.CompilerParams(
            dimension_semantics=("parallel",),
            vmem_limit_bytes=vmem_limit,
        ),
    )(x_in, gamma_in, beta_in)

    if pack:
        out = out.reshape(rows_p, features)[:rows]
    return out.reshape(*lead_shape, features)


if __name__ == "__main__":
    def ref_layer_norm(x, gamma, beta, eps=1e-6):
        mean = jnp.mean(x, axis=-1, keepdims=True)
        std = jnp.sqrt(jnp.mean((x - mean) ** 2, axis=-1, keepdims=True))
        return gamma * (x - mean) / (std + eps) + beta

    # Small-feature (lane-packed) case: the module's demo shape.
    key = jax.random.PRNGKey(0)
    batch, seq, hidden = 2, 8, 32
    x = jax.random.normal(key, (batch, seq, hidden), dtype=jnp.float32)
    gamma = jnp.ones((hidden,), dtype=jnp.float32)   # matches nn.Parameter(torch.ones)
    beta = jnp.zeros((hidden,), dtype=jnp.float32)   # matches nn.Parameter(torch.zeros)

    out = jax.block_until_ready(layer_norm(x, gamma, beta, eps=1e-6))
    ref = ref_layer_norm(x, gamma, beta, eps=1e-6)
    assert out.shape == x.shape
    assert jnp.allclose(out, ref, atol=2e-5, rtol=2e-5), "packed-path mismatch vs reference"

    # Lane-dense (standard) path: features a multiple of 128.
    hidden2 = 128
    x2 = jax.random.normal(jax.random.PRNGKey(1), (batch, seq, hidden2), dtype=jnp.float32)
    gamma2 = jax.random.normal(jax.random.PRNGKey(2), (hidden2,), dtype=jnp.float32)
    beta2 = jax.random.normal(jax.random.PRNGKey(3), (hidden2,), dtype=jnp.float32)
    out2 = jax.block_until_ready(layer_norm(x2, gamma2, beta2, eps=1e-6))
    ref2 = ref_layer_norm(x2, gamma2, beta2, eps=1e-6)
    assert jnp.allclose(out2, ref2, atol=2e-5, rtol=2e-5), "standard-path mismatch vs reference"

    print("KERNEL_OK")
</pallas_src>

<mosaic_0001>
module attributes {stable_mosaic.version = 11 : i64} {
  func.func @_layernorm_packed_kernel(%arg0: i32, %arg1: memref<8x128xf32, #tpu.memory_space<vmem>>, %arg2: memref<1x128xf32, #tpu.memory_space<vmem>>, %arg3: memref<1x128xf32, #tpu.memory_space<vmem>>, %arg4: memref<8x128xf32, #tpu.memory_space<vmem>>) attributes {dimension_semantics = [#tpu.dimension_semantics<parallel>], iteration_bounds = array<i64: 1>, scalar_prefetch = 0 : i64, scratch_operands = 0 : i64, tpu.core_type = #tpu.core_type<tc>, window_params = [{transform_indices = @transform_0, window_bounds = array<i64: 8, 128>}, {pipeline_mode = #tpu.pipeline_mode<synchronous>, transform_indices = @transform_1, window_bounds = array<i64: 1, 128>}, {pipeline_mode = #tpu.pipeline_mode<synchronous>, transform_indices = @transform_2, window_bounds = array<i64: 1, 128>}, {transform_indices = @transform_3, window_bounds = array<i64: 8, 128>}]} {
    %c0 = arith.constant 0 : index
    %c0_0 = arith.constant 0 : index
    %0 = vector.load %arg1[%c0, %c0_0] : memref<8x128xf32, #tpu.memory_space<vmem>>, vector<8x32xf32>
    %cst = arith.constant dense<0.000000e+00> : vector<8xf32>
    %1 = vector.multi_reduction <add>, %0, %cst [1] : vector<8x32xf32> to vector<8xf32>
    %2 = vector.shape_cast %1 : vector<8xf32> to vector<8x1xf32>
    %cst_1 = arith.constant 3.125000e-02 : f32
    %3 = vector.broadcast %cst_1 : f32 to vector<8x1xf32>
    %4 = arith.mulf %2, %3 : vector<8x1xf32>
    %5 = arith.mulf %0, %0 : vector<8x32xf32>
    %cst_2 = arith.constant dense<0.000000e+00> : vector<8xf32>
    %6 = vector.multi_reduction <add>, %5, %cst_2 [1] : vector<8x32xf32> to vector<8xf32>
    %7 = vector.shape_cast %6 : vector<8xf32> to vector<8x1xf32>
    %cst_3 = arith.constant 3.125000e-02 : f32
    %8 = vector.broadcast %cst_3 : f32 to vector<8x1xf32>
    %9 = arith.mulf %7, %8 : vector<8x1xf32>
    %10 = arith.mulf %4, %4 : vector<8x1xf32>
    %11 = arith.subf %9, %10 : vector<8x1xf32>
    %cst_4 = arith.constant 0.000000e+00 : f32
    %12 = vector.broadcast %cst_4 : f32 to vector<8x1xf32>
    %13 = arith.maximumf %11, %12 : vector<8x1xf32>
    %14 = math.sqrt %13 : vector<8x1xf32>
    %cst_5 = arith.constant 9.99999997E-7 : f32
    %15 = vector.broadcast %cst_5 : f32 to vector<8x1xf32>
    %16 = arith.addf %14, %15 : vector<8x1xf32>
    %cst_6 = arith.constant 1.000000e+00 : f32
    %17 = vector.broadcast %cst_6 : f32 to vector<8x1xf32>
    %18 = arith.divf %17, %16 : vector<8x1xf32>
    %19 = vector.broadcast %4 : vector<8x1xf32> to vector<8x32xf32>
    %20 = arith.subf %0, %19 : vector<8x32xf32>
    %21 = vector.broadcast %18 : vector<8x1xf32> to vector<8x32xf32>
    %22 = arith.mulf %20, %21 : vector<8x32xf32>
    %c0_7 = arith.constant 0 : index
    %c0_8 = arith.constant 0 : index
    %23 = vector.load %arg2[%c0_7, %c0_8] : memref<1x128xf32, #tpu.memory_space<vmem>>, vector<1x32xf32>
    %24 = vector.broadcast %23 : vector<1x32xf32> to vector<8x32xf32>
    %25 = arith.mulf %22, %24 : vector<8x32xf32>
    %c0_9 = arith.constant 0 : index
    %c0_10 = arith.constant 0 : index
    %26 = vector.load %arg3[%c0_9, %c0_10] : memref<1x128xf32, #tpu.memory_space<vmem>>, vector<1x32xf32>
    %27 = vector.broadcast %26 : vector<1x32xf32> to vector<8x32xf32>
    %28 = arith.addf %25, %27 : vector<8x32xf32>
    %c0_11 = arith.constant 0 : index
    %c0_12 = arith.constant 0 : index
    %29 = vector.load %arg4[%c0_11, %c0_12] : memref<8x128xf32, #tpu.memory_space<vmem>>, vector<8x32xf32>
    tpu.vector_store %arg4[%c0_11, %c0_12], %28 {strides = array<i32>} : memref<8x128xf32, #tpu.memory_space<vmem>>, vector<8x32xf32>,
    %c0_13 = arith.constant 0 : index
    %c32 = arith.constant 32 : index
    %30 = vector.load %arg1[%c0_13, %c32] : memref<8x128xf32, #tpu.memory_space<vmem>>, vector<8x32xf32>
    %cst_14 = arith.constant dense<0.000000e+00> : vector<8xf32>
    %31 = vector.multi_reduction <add>, %30, %cst_14 [1] : vector<8x32xf32> to vector<8xf32>
    %32 = vector.shape_cast %31 : vector<8xf32> to vector<8x1xf32>
    %cst_15 = arith.constant 3.125000e-02 : f32
    %33 = vector.broadcast %cst_15 : f32 to vector<8x1xf32>
    %34 = arith.mulf %32, %33 : vector<8x1xf32>
    %35 = arith.mulf %30, %30 : vector<8x32xf32>
    %cst_16 = arith.constant dense<0.000000e+00> : vector<8xf32>
    %36 = vector.multi_reduction <add>, %35, %cst_16 [1] : vector<8x32xf32> to vector<8xf32>
    %37 = vector.shape_cast %36 : vector<8xf32> to vector<8x1xf32>
    %cst_17 = arith.constant 3.125000e-02 : f32
    %38 = vector.broadcast %cst_17 : f32 to vector<8x1xf32>
    %39 = arith.mulf %37, %38 : vector<8x1xf32>
    %40 = arith.mulf %34, %34 : vector<8x1xf32>
    %41 = arith.subf %39, %40 : vector<8x1xf32>
    %cst_18 = arith.constant 0.000000e+00 : f32
    %42 = vector.broadcast %cst_18 : f32 to vector<8x1xf32>
    %43 = arith.maximumf %41, %42 : vector<8x1xf32>
    %44 = math.sqrt %43 : vector<8x1xf32>
    %cst_19 = arith.constant 9.99999997E-7 : f32
    %45 = vector.broadcast %cst_19 : f32 to vector<8x1xf32>
    %46 = arith.addf %44, %45 : vector<8x1xf32>
    %cst_20 = arith.constant 1.000000e+00 : f32
    %47 = vector.broadcast %cst_20 : f32 to vector<8x1xf32>
    %48 = arith.divf %47, %46 : vector<8x1xf32>
    %49 = vector.broadcast %34 : vector<8x1xf32> to vector<8x32xf32>
    %50 = arith.subf %30, %49 : vector<8x32xf32>
    %51 = vector.broadcast %48 : vector<8x1xf32> to vector<8x32xf32>
    %52 = arith.mulf %50, %51 : vector<8x32xf32>
    %c0_21 = arith.constant 0 : index
    %c32_22 = arith.constant 32 : index
    %53 = vector.load %arg2[%c0_21, %c32_22] : memref<1x128xf32, #tpu.memory_space<vmem>>, vector<1x32xf32>
    %54 = vector.broadcast %53 : vector<1x32xf32> to vector<8x32xf32>
    %55 = arith.mulf %52, %54 : vector<8x32xf32>
    %c0_23 = arith.constant 0 : index
    %c32_24 = arith.constant 32 : index
    %56 = vector.load %arg3[%c0_23, %c32_24] : memref<1x128xf32, #tpu.memory_space<vmem>>, vector<1x32xf32>
    %57 = vector.broadcast %56 : vector<1x32xf32> to vector<8x32xf32>
    %58 = arith.addf %55, %57 : vector<8x32xf32>
    %c0_25 = arith.constant 0 : index
    %c32_26 = arith.constant 32 : index
    %59 = vector.load %arg4[%c0_25, %c32_26] : memref<8x128xf32, #tpu.memory_space<vmem>>, vector<8x32xf32>
    tpu.vector_store %arg4[%c0_25, %c32_26], %58 {strides = array<i32>} : memref<8x128xf32, #tpu.memory_space<vmem>>, vector<8x32xf32>,
    %c0_27 = arith.constant 0 : index
    %c64 = arith.constant 64 : index
    %60 = vector.load %arg1[%c0_27, %c64] : memref<8x128xf32, #tpu.memory_space<vmem>>, vector<8x32xf32>
    %cst_28 = arith.constant dense<0.000000e+00> : vector<8xf32>
    %61 = vector.multi_reduction <add>, %60, %cst_28 [1] : vector<8x32xf32> to vector<8xf32>
    %62 = vector.shape_cast %61 : vector<8xf32> to vector<8x1xf32>
    %cst_29 = arith.constant 3.125000e-02 : f32
    %63 = vector.broadcast %cst_29 : f32 to vector<8x1xf32>
    %64 = arith.mulf %62, %63 : vector<8x1xf32>
    %65 = arith.mulf %60, %60 : vector<8x32xf32>
    %cst_30 = arith.constant dense<0.000000e+00> : vector<8xf32>
    %66 = vector.multi_reduction <add>, %65, %cst_30 [1] : vector<8x32xf32> to vector<8xf32>
    %67 = vector.shape_cast %66 : vector<8xf32> to vector<8x1xf32>
    %cst_31 = arith.constant 3.125000e-02 : f32
    %68 = vector.broadcast %cst_31 : f32 to vector<8x1xf32>
    %69 = arith.mulf %67, %68 : vector<8x1xf32>
    %70 = arith.mulf %64, %64 : vector<8x1xf32>
    %71 = arith.subf %69, %70 : vector<8x1xf32>
    %cst_32 = arith.constant 0.000000e+00 : f32
    %72 = vector.broadcast %cst_32 : f32 to vector<8x1xf32>
    %73 = arith.maximumf %71, %72 : vector<8x1xf32>
    %74 = math.sqrt %73 : vector<8x1xf32>
    %cst_33 = arith.constant 9.99999997E-7 : f32
    %75 = vector.broadcast %cst_33 : f32 to vector<8x1xf32>
    %76 = arith.addf %74, %75 : vector<8x1xf32>
    %cst_34 = arith.constant 1.000000e+00 : f32
    %77 = vector.broadcast %cst_34 : f32 to vector<8x1xf32>
    %78 = arith.divf %77, %76 : vector<8x1xf32>
    %79 = vector.broadcast %64 : vector<8x1xf32> to vector<8x32xf32>
    %80 = arith.subf %60, %79 : vector<8x32xf32>
    %81 = vector.broadcast %78 : vector<8x1xf32> to vector<8x32xf32>
    %82 = arith.mulf %80, %81 : vector<8x32xf32>
    %c0_35 = arith.constant 0 : index
    %c64_36 = arith.constant 64 : index
    %83 = vector.load %arg2[%c0_35, %c64_36] : memref<1x128xf32, #tpu.memory_space<vmem>>, vector<1x32xf32>
    %84 = vector.broadcast %83 : vector<1x32xf32> to vector<8x32xf32>
    %85 = arith.mulf %82, %84 : vector<8x32xf32>
    %c0_37 = arith.constant 0 : index
    %c64_38 = arith.constant 64 : index
    %86 = vector.load %arg3[%c0_37, %c64_38] : memref<1x128xf32, #tpu.memory_space<vmem>>, vector<1x32xf32>
    %87 = vector.broadcast %86 : vector<1x32xf32> to vector<8x32xf32>
    %88 = arith.addf %85, %87 : vector<8x32xf32>
    %c0_39 = arith.constant 0 : index
    %c64_40 = arith.constant 64 : index
    %89 = vector.load %arg4[%c0_39, %c64_40] : memref<8x128xf32, #tpu.memory_space<vmem>>, vector<8x32xf32>
    tpu.vector_store %arg4[%c0_39, %c64_40], %88 {strides = array<i32>} : memref<8x128xf32, #tpu.memory_space<vmem>>, vector<8x32xf32>,
    %c0_41 = arith.constant 0 : index
    %c96 = arith.constant 96 : index
    %90 = vector.load %arg1[%c0_41, %c96] : memref<8x128xf32, #tpu.memory_space<vmem>>, vector<8x32xf32>
    %cst_42 = arith.constant dense<0.000000e+00> : vector<8xf32>
    %91 = vector.multi_reduction <add>, %90, %cst_42 [1] : vector<8x32xf32> to vector<8xf32>
    %92 = vector.shape_cast %91 : vector<8xf32> to vector<8x1xf32>
    %cst_43 = arith.constant 3.125000e-02 : f32
    %93 = vector.broadcast %cst_43 : f32 to vector<8x1xf32>
    %94 = arith.mulf %92, %93 : vector<8x1xf32>
    %95 = arith.mulf %90, %90 : vector<8x32xf32>
    %cst_44 = arith.constant dense<0.000000e+00> : vector<8xf32>
    %96 = vector.multi_reduction <add>, %95, %cst_44 [1] : vector<8x32xf32> to vector<8xf32>
    %97 = vector.shape_cast %96 : vector<8xf32> to vector<8x1xf32>
    %cst_45 = arith.constant 3.125000e-02 : f32
    %98 = vector.broadcast %cst_45 : f32 to vector<8x1xf32>
    %99 = arith.mulf %97, %98 : vector<8x1xf32>
    %100 = arith.mulf %94, %94 : vector<8x1xf32>
    %101 = arith.subf %99, %100 : vector<8x1xf32>
    %cst_46 = arith.constant 0.000000e+00 : f32
    %102 = vector.broadcast %cst_46 : f32 to vector<8x1xf32>
    %103 = arith.maximumf %101, %102 : vector<8x1xf32>
    %104 = math.sqrt %103 : vector<8x1xf32>
    %cst_47 = arith.constant 9.99999997E-7 : f32
    %105 = vector.broadcast %cst_47 : f32 to vector<8x1xf32>
    %106 = arith.addf %104, %105 : vector<8x1xf32>
    %cst_48 = arith.constant 1.000000e+00 : f32
    %107 = vector.broadcast %cst_48 : f32 to vector<8x1xf32>
    %108 = arith.divf %107, %106 : vector<8x1xf32>
    %109 = vector.broadcast %94 : vector<8x1xf32> to vector<8x32xf32>
    %110 = arith.subf %90, %109 : vector<8x32xf32>
    %111 = vector.broadcast %108 : vector<8x1xf32> to vector<8x32xf32>
    %112 = arith.mulf %110, %111 : vector<8x32xf32>
    %c0_49 = arith.constant 0 : index
    %c96_50 = arith.constant 96 : index
    %113 = vector.load %arg2[%c0_49, %c96_50] : memref<1x128xf32, #tpu.memory_space<vmem>>, vector<1x32xf32>
    %114 = vector.broadcast %113 : vector<1x32xf32> to vector<8x32xf32>
    %115 = arith.mulf %112, %114 : vector<8x32xf32>
    %c0_51 = arith.constant 0 : index
    %c96_52 = arith.constant 96 : index
    %116 = vector.load %arg3[%c0_51, %c96_52] : memref<1x128xf32, #tpu.memory_space<vmem>>, vector<1x32xf32>
    %117 = vector.broadcast %116 : vector<1x32xf32> to vector<8x32xf32>
    %118 = arith.addf %115, %117 : vector<8x32xf32>
    %c0_53 = arith.constant 0 : index
    %c96_54 = arith.constant 96 : index
    %119 = vector.load %arg4[%c0_53, %c96_54] : memref<8x128xf32, #tpu.memory_space<vmem>>, vector<8x32xf32>
    tpu.vector_store %arg4[%c0_53, %c96_54], %118 {strides = array<i32>} : memref<8x128xf32, #tpu.memory_space<vmem>>, vector<8x32xf32>,
    return
  }
  func.func @transform_0(%arg0: i32) -> (i32, i32) {
    %c0_i32 = arith.constant 0 : i32
    %c0_i32_0 = arith.constant 0 : i32
    return %arg0, %c0_i32 : i32, i32
  }
  func.func @transform_1(%arg0: i32) -> (i32, i32) {
    %c0_i32 = arith.constant 0 : i32
    %c0_i32_0 = arith.constant 0 : i32
    %c0_i32_1 = arith.constant 0 : i32
    return %c0_i32, %c0_i32_0 : i32, i32
  }
  func.func @transform_2(%arg0: i32) -> (i32, i32) {
    %c0_i32 = arith.constant 0 : i32
    %c0_i32_0 = arith.constant 0 : i32
    %c0_i32_1 = arith.constant 0 : i32
    return %c0_i32, %c0_i32_0 : i32, i32
  }
  func.func @transform_3(%arg0: i32) -> (i32, i32) {
    %c0_i32 = arith.constant 0 : i32
    %c0_i32_0 = arith.constant 0 : i32
    return %arg0, %c0_i32 : i32, i32
  }
}

</mosaic_0001>

<bundles_post_ra>
// kernel: tpu_custom_call.1
= control target key start
LH: loop header
LB: loop body
LE: loop exit
PB: predicated region body
PF: predicated region fallthrough
CT: control target
= control target key end

     0   :  { %8 = vsyncpa [#allocation3], 0  ;;  %s395_s0 = inlined_call_operand.hbm [shape: f32[4,128], index: 0, kind: input, shape index: {}]   ;;  %s396_s1 = inlined_call_operand.vmem [shape: f32[1,128], index: 1, kind: input, shape index: {}]   ;;  %s397_s2 = inlined_call_operand.vmem [shape: f32[1,128], index: 2, kind: input, shape index: {}]   ;;  %s398_s3 = inlined_call_operand.hbm [shape: f32[4,128], index: 3, kind: output, shape index: {}]  }
   0x1   :  { %9 = vsyncpa [#allocation4], 0 }
   0x2   :  { %14 = vsyncadd [#allocation3], 64  ;;  %s316_s12 = smov [#allocation2]  }
   0x3   :  { %s15_s13 = sshll.u32 %s316_s12, 4  ;;  %s16_s13 = int_to_ptr.vmem [resolvable:$true] %s15_s13 }
   0x4   :  { %s280_s14 = scalar_lea.vmem %s16_s13, 64  ;;  %s284_s15 = scalar_lea.vmem %s16_s13, 128 }
   0x5   :  { %p281_p0 = scmp.ne.s32.totalorder %s16_s13, %s280_s14  ;;  %p285_p1 = scmp.lt.s32.totalorder %s16_s13, %s16_s13 }
   0x6   :  { %p286_p2 = scmp.lt.s32.totalorder %s284_s15, %s280_s14 }
   0x8   :  { %p287_p3 = por %p286_p2, %p285_p1 }
   0xa   :  { %p288_p4 = pnand %p287_p3, %p281_p0 }
   0xc   :  { %291 = shalt.err (!%p288_p4)
}
   0xd   :  { %s317_s16 = smov 64   ;;  %s318_s17 = smov 4  }
   0xe   :  { %21 = dma.hbm_to_vmem [thread:$0]  %s395_s0, 64, %s16_s13, [#allocation3], %s317_s16, %s317_s16, %s318_s17  }
   0xf   :  { %312 = dma.done.wait [#allocation3], 128  }
  0x10   :  { %313 = vsyncadd [#allocation3], 4294967168  ;;  %v348_v0 = vld [vmem:[#allocation2] sm:$0xff]  ;;  %s319_s20 = smov 32   ;;  %s320_s21 = smov 96   ;;  %vm30_vm0 = vcmask 261120  }
  0x11   :  { %176 = vrot.lane.b32.xlu1 %v348_v0, %s319_s20  ;;  %74 = vrot.lane.b32.xlu0 %v348_v0, %s320_s21  ;;  %v81_v1 = vmul.f32 %v348_v0, %v348_v0  ;;  %v31_v2 = vsel %vm30_vm0, %v348_v0, 0.0  ;;  %v370_v31 = vld [vmem:[%s396_s1] ss:$0 sm:$0xff]  ;;  %vm121_vm9 = vcmask 523520   ;;  %vm172_vm10 = vcmask 785920  }
  0x12   :  { %v375_v33 = vld [vmem:[%s397_s2] ss:$0 sm:$0xff]  ;;  %vm223_vm11 = vcmask 1048320  }
  0x13   :  { %v36_v3 = vsel %vm30_vm0, %v81_v1, 0.0 }
  0x15   :  { %125 = vrot.lane.b32.xlu0 %v348_v0, %s317_s16  ;;  %83 = vrot.lane.b32.xlu1 %v81_v1, %s320_s21 }
  0x19   :  { %134 = vrot.lane.b32.xlu0 %v81_v1, %s317_s16  ;;  %185 = vrot.lane.b32.xlu1 %v81_v1, %s319_s20 }
  0x38   :  { %32 = vadd.xlane.f32.xlu0 %v31_v2 }
  0x3d   :  { %37 = vadd.xlane.f32.xlu1 %v36_v3 }
  0x83   :  { %v177_v4 = vpop.permute.xlu1 %176  ;;  %v75_v5 = vpop.permute.xlu0 %74 }
  0x84   :  { %v77_v6 = vsel %vm30_vm0, %v75_v5, 0.0  ;;  %v179_v13 = vsel %vm30_vm0, %v177_v4, 0.0 }
  0x85   :  { %78 = vadd.xlane.f32.xlu0 %v77_v6 }
  0x87   :  { %v126_v7 = vpop.permute.xlu0 %125  ;;  %v84_v8 = vpop.permute.xlu1 %83 }
  0x88   :  { %v128_v9 = vsel %vm30_vm0, %v126_v7, 0.0  ;;  %v86_v10 = vsel %vm30_vm0, %v84_v8, 0.0 }
  0x89   :  { %129 = vadd.xlane.f32.xlu1 %v128_v9  ;;  %87 = vadd.xlane.f32.xlu0 %v86_v10 }
  0x8b   :  { %v135_v11 = vpop.permute.xlu0 %134  ;;  %v186_v12 = vpop.permute.xlu1 %185 }
  0x8c   :  { %v137_v14 = vsel %vm30_vm0, %v135_v11, 0.0  ;;  %v188_v15 = vsel %vm30_vm0, %v186_v12, 0.0 }
  0x8d   :  { %180 = vadd.xlane.f32.xlu1 %v179_v13  ;;  %138 = vadd.xlane.f32.xlu0 %v137_v14 }
  0x91   :  { %189 = vadd.xlane.f32.xlu0 %v188_v15 }
  0xc1   :  { %v33_v16 = vpop.xlane.xlu0 %32 }
  0xc2   :  { %v34_v17 = vmul.f32 0.03125, %v33_v16 }
  0xc4   :  { %v40_v18 = vmul.f32 %v34_v17, %v34_v17  ;;  %v53_v29 = vsub.f32 %v348_v0, %v34_v17 }
  0xc6   :  { %v38_v19 = vpop.xlane.xlu1 %37 }
  0xc7   :  { %v39_v20 = vmul.f32 0.03125, %v38_v19 }
  0xc9   :  { %v41_v21 = vsub.f32 %v39_v20, %v40_v18 }
  0xcb   :  { %v42_v22 = vmax.f32 %v41_v21, 0.0 }
  0xcd   :  { %256 = vrsqrt.f32 %v42_v22  ;;  %vm45_vm1 = vcmp.eq.f32.partialorder %v42_v22, inf  ;;  %v48_v24 = vand.u32 2147483648, %v42_v22  ;;  %vm47_vm2 = vcmp.eq.f32.partialorder %v42_v22, 0.0 }
  0xda   :  { %v257_v23 = vpop.eup %256 }
  0xdb   :  { %v44_v25 = vmul.f32 %v257_v23, %v42_v22 }
  0xdd   :  { %v46_v26 = vsel %vm45_vm1, %v42_v22, %v44_v25 }
  0xde   :  { %v49_v27 = vsel %vm47_vm2, %v48_v24, %v46_v26 }
  0xdf   :  { %v50_v28 = vadd.f32 1e-06, %v49_v27 }
  0xe1   :  { %258 = vrcp.f32 %v50_v28 }
  0xee   :  { %v259_v30 = vpop.eup %258 }
  0xef   :  { %v54_v32 = vmul.f32 %v259_v30, %v53_v29 }
  0xf1   :  { %v62_v34 = vmul.f32 %v370_v31, %v54_v32 }
  0xf3   :  { %v70_v35 = vadd.f32 %v375_v33, %v62_v34 }
  0xf5   :  { %71 = vst.msk [vmem:[#allocation5] sm:$0xff] %vm30_vm0, %v70_v35 }
 0x10e   :  { %v79_v36 = vpop.xlane.xlu0 %78 }
 0x10f   :  { %v80_v37 = vmul.f32 0.03125, %v79_v36 }
 0x111   :  { %v90_v40 = vmul.f32 %v80_v37, %v80_v37  ;;  %v103_v12 = vsub.f32 %v348_v0, %v80_v37 }
 0x112   :  { %v130_v38 = vpop.xlane.xlu1 %129  ;;  %v88_v39 = vpop.xlane.xlu0 %87 }
 0x113   :  { %v89_v41 = vmul.f32 0.03125, %v88_v39  ;;  %v131_v42 = vmul.f32 0.03125, %v130_v38 }
 0x115   :  { %v91_v43 = vsub.f32 %v89_v41, %v90_v40  ;;  %v141_v49 = vmul.f32 %v131_v42, %v131_v42  ;;  %v154_v16 = vsub.f32 %v348_v0, %v131_v42 }
 0x116   :  { %v181_v44 = vpop.xlane.xlu1 %180  ;;  %v139_v45 = vpop.xlane.xlu0 %138 }
 0x117   :  { %v92_v46 = vmax.f32 %v91_v43, 0.0  ;;  %v182_v47 = vmul.f32 0.03125, %v181_v44  ;;  %v140_v48 = vmul.f32 0.03125, %v139_v45 }
 0x119   :  { %260 = vrsqrt.f32 %v92_v46  ;;  %v142_v50 = vsub.f32 %v140_v48, %v141_v49  ;;  %v192_v52 = vmul.f32 %v182_v47, %v182_v47  ;;  %vm95_vm3 = vcmp.eq.f32.partialorder %v92_v46, inf }
 0x11a   :  { %v190_v51 = vpop.xlane.xlu0 %189  ;;  %v98_v59 = vand.u32 2147483648, %v92_v46  ;;  %vm97_vm4 = vcmp.eq.f32.partialorder %v92_v46, 0.0  ;;  %v205_v20 = vsub.f32 %v348_v0, %v182_v47 }
 0x11b   :  { %v191_v53 = vmul.f32 0.03125, %v190_v51  ;;  %v143_v54 = vmax.f32 %v142_v50, 0.0 }
 0x11d   :  { %v193_v55 = vsub.f32 %v191_v53, %v192_v52  ;;  %262 = vrsqrt.f32 %v143_v54  ;;  %vm146_vm5 = vcmp.eq.f32.partialorder %v143_v54, inf  ;;  %v149_v2 = vand.u32 2147483648, %v143_v54 }
 0x11e   :  { %vm148_vm6 = vcmp.eq.f32.partialorder %v143_v54, 0.0 }
 0x11f   :  { %v194_v56 = vmax.f32 %v193_v55, 0.0 }
 0x121   :  { %264 = vrsqrt.f32 %v194_v56  ;;  %vm197_vm7 = vcmp.eq.f32.partialorder %v194_v56, inf  ;;  %v200_v8 = vand.u32 2147483648, %v194_v56  ;;  %vm199_vm8 = vcmp.eq.f32.partialorder %v194_v56, 0.0 }
 0x126   :  { %v261_v57 = vpop.eup %260 }
 0x127   :  { %v94_v58 = vmul.f32 %v261_v57, %v92_v46 }
 0x129   :  { %v96_v60 = vsel %vm95_vm3, %v92_v46, %v94_v58 }
 0x12a   :  { %v99_v61 = vsel %vm97_vm4, %v98_v59, %v96_v60  ;;  %v263_v62 = vpop.eup %262 }
 0x12b   :  { %v100_v63 = vadd.f32 1e-06, %v99_v61  ;;  %v145_v1 = vmul.f32 %v263_v62, %v143_v54 }
 0x12d   :  { %266 = vrcp.f32 %v100_v63  ;;  %v147_v4 = vsel %vm146_vm5, %v143_v54, %v145_v1 }
 0x12e   :  { %v265_v3 = vpop.eup %264  ;;  %v150_v5 = vsel %vm148_vm6, %v149_v2, %v147_v4 }
 0x12f   :  { %v196_v6 = vmul.f32 %v265_v3, %v194_v56  ;;  %v151_v7 = vadd.f32 1e-06, %v150_v5 }
 0x131   :  { %v198_v9 = vsel %vm197_vm7, %v194_v56, %v196_v6  ;;  %268 = vrcp.f32 %v151_v7 }
 0x132   :  { %v201_v10 = vsel %vm199_vm8, %v200_v8, %v198_v9 }
 0x133   :  { %v202_v11 = vadd.f32 1e-06, %v201_v10 }
 0x135   :  { %270 = vrcp.f32 %v202_v11 }
 0x13a   :  { %v267_v13 = vpop.eup %266 }
 0x13b   :  { %v104_v14 = vmul.f32 %v267_v13, %v103_v12 }
 0x13d   :  { %v112_v15 = vmul.f32 %v370_v31, %v104_v14 }
 0x13e   :  { %v269_v17 = vpop.eup %268 }
 0x13f   :  { %v120_v18 = vadd.f32 %v375_v33, %v112_v15  ;;  %v155_v19 = vmul.f32 %v269_v17, %v154_v16 }
 0x141   :  { %122 = vst.msk [vmem:[#allocation5] sm:$0xff] %vm121_vm9, %v120_v18  ;;  %v163_v22 = vmul.f32 %v370_v31, %v155_v19 }
 0x142   :  { %v271_v21 = vpop.eup %270 }
 0x143   :  { %v206_v23 = vmul.f32 %v271_v21, %v205_v20  ;;  %v171_v24 = vadd.f32 %v375_v33, %v163_v22 }
 0x145   :  { %v214_v25 = vmul.f32 %v370_v31, %v206_v23  ;;  %173 = vst.msk [vmem:[#allocation5] sm:$0xff] %vm172_vm10, %v171_v24 }
 0x147   :  { %v222_v26 = vadd.f32 %v375_v33, %v214_v25 }
 0x149   :  { %224 = vst.msk [vmem:[#allocation5] sm:$0xff] %vm223_vm11, %v222_v26 }
 0x14a   :  { %229 = vsyncadd [#allocation4], 64  ;;  %s321_s1 = smov [#allocation5]  }
 0x14b   :  { %s230_s2 = sshll.u32 %s321_s1, 4  ;;  %s231_s2 = int_to_ptr.vmem [resolvable:$true] %s230_s2 }
 0x14c   :  { %s292_s25 = scalar_lea.vmem %s231_s2, 64  ;;  %s296_s26 = scalar_lea.vmem %s231_s2, 128 }
 0x14d   :  { %p293_p5 = scmp.ne.s32.totalorder %s231_s2, %s292_s25  ;;  %p297_p6 = scmp.lt.s32.totalorder %s231_s2, %s231_s2 }
 0x14e   :  { %p298_p7 = scmp.lt.s32.totalorder %s296_s26, %s292_s25 }
 0x150   :  { %p299_p8 = por %p298_p7, %p297_p6 }
 0x152   :  { %p300_p9 = pnand %p299_p8, %p293_p5 }
 0x154   :  { %303 = shalt.err (!%p300_p9)
}
 0x155   :  { %236 = dma.vmem_to_hbm [thread:$0]  %s231_s2, 64, %s398_s3, [#allocation4], %s317_s16, %s317_s16, %s318_s17  }
 0x156   :  { %314 = dma.done.wait [#allocation4], 128  }
 0x157   :  { %315 = vsyncadd [#allocation4], 4294967168 }
 0x158   :  { %240 = vsyncpa [#allocation3], 1 }
 0x159   :  { %241 = vsyncpa [#allocation4], 1 }

</bundles_post_ra>
